<compile_context>
chip_gen: v7x
topology: tpu7x:2x2x1
jax: 0.10.0
libtpu: 0.0.40
codegen_flags: <defaults>
</compile_context>

<pallas_src>
import jax
import jax.numpy as jnp
from jax.experimental import pallas as pl
from jax.experimental.pallas import tpu as pltpu


# --------------------------------------------------------------------------- #
# Kernel
# --------------------------------------------------------------------------- #
def critic_kernel(s_ref, a_ref,
                  w14_ref, b14_ref,
                  w2_ref, b2_ref, w5_ref, b5_ref,
                  w3r_ref, w6r_ref, b36_ref,
                  q_ref):
    """Twin Q-head MLP, fully fused.

    Layer 1 (fused heads, one MXU pass):
        hg = relu([s, a] @ W14 + b14)                      (TB, 512)
    Layer 2 (per head, MXU):
        h2 = relu(hg[:, :256] @ W2 + b2)
        g2 = relu(hg[:, 256:] @ W5 + b5)
    Layer 3 (off the MXU -> VPU mul + XLU lane reduce):
        q1 = sum(h2 * w3_row, -1) ;  q2 = sum(g2 * w6_row, -1)
        q  = [q1, q2] + b36                                (TB, 2)
    """
    wdt = w14_ref.dtype                       # weight storage dtype (bf16 or f32)
    hidden = w2_ref.shape[0]                  # 256

    # In-kernel lane concat of state/action -> single K=(S+A) matmul.
    sa = jnp.concatenate([s_ref[...], a_ref[...]], axis=1).astype(wdt)

    hg = jnp.dot(sa, w14_ref[...], preferred_element_type=jnp.float32) + b14_ref[...]
    hg = jnp.maximum(hg, 0.0)

    h1 = hg[:, :hidden].astype(wdt)           # lane-aligned slices (256 = 2*128)
    g1 = hg[:, hidden:].astype(wdt)

    h2 = jnp.maximum(
        jnp.dot(h1, w2_ref[...], preferred_element_type=jnp.float32) + b2_ref[...], 0.0)
    g2 = jnp.maximum(
        jnp.dot(g1, w5_ref[...], preferred_element_type=jnp.float32) + b5_ref[...], 0.0)

    # Layer 3: VPU multiply + cross-lane reduce (hides under MXU slots).
    q1 = jnp.sum(h2 * w3r_ref[...], axis=-1, keepdims=True)   # (TB, 1) f32
    q2 = jnp.sum(g2 * w6r_ref[...], axis=-1, keepdims=True)   # (TB, 1) f32
    q = jnp.concatenate([q1, q2], axis=1) + b36_ref[...]      # (TB, 2)
    q_ref[...] = q.astype(q_ref.dtype)


# --------------------------------------------------------------------------- #
# Wrapper
# --------------------------------------------------------------------------- #
def _round_up(x, m):
    return ((x + m - 1) // m) * m


def critic_forward(state, action, fused_params, *, tile_batch=1024):
    """Runs the fused Pallas kernel.  Returns (q1, q2), each (B, 1) f32."""
    B, S = state.shape
    A = action.shape[1]
    (w14, b14, w2, b2, w5, b5, w3r, w6r, b36) = fused_params
    hidden2 = b14.shape[1]                    # 512
    hidden = hidden2 // 2                     # 256
    in_dim = S + A

    # ---- batch tiling ---------------------------------------------------- #
    # Pad batch to a sublane multiple, aim for >= 2 grid steps (v7x megacore
    # sharding + DMA/compute overlap), never leave a ragged trailing tile.
    B_pad = _round_up(max(B, 8), 8)
    if B_pad >= 16:
        TB = min(tile_batch, _round_up(pl.cdiv(B_pad, 2), 8))
    else:
        TB = B_pad
    B_pad = _round_up(B_pad, TB)

    if B_pad != B:
        pad = B_pad - B
        state = jnp.pad(state, ((0, pad), (0, 0)))
        action = jnp.pad(action, ((0, pad), (0, 0)))

    grid = (B_pad // TB,)

    def resident(x):
        # Weights / biases: same block every grid step -> stay in VMEM.
        # (pipeline_mode=pl.Buffered(1) would shave the second buffer, but the
        #  weights are <0.3 MB bf16 so the headroom win is negligible.)
        return pl.BlockSpec(x.shape, lambda i: (0, 0))

    in_specs = [
        pl.BlockSpec((TB, S), lambda i: (i, 0)),     # state tile
        pl.BlockSpec((TB, A), lambda i: (i, 0)),     # action tile
        resident(w14), resident(b14),
        resident(w2), resident(b2),
        resident(w5), resident(b5),
        resident(w3r), resident(w6r), resident(b36),
    ]
    # Keep the tiny lane-2 output (masked stores, but only 8*B output bytes);
    # padding it to 128 lanes would inflate HBM writeback 64x for no gain.
    out_specs = pl.BlockSpec((TB, 2), lambda i: (i, 0))

    flops = 2 * B_pad * (in_dim * hidden2 + 2 * hidden * hidden) + 4 * B_pad * hidden
    bytes_accessed = (sum(int(x.size) * x.dtype.itemsize
                          for x in (state, action) + tuple(fused_params))
                      + B_pad * 2 * 4)
    cost = pl.CostEstimate(flops=flops, transcendentals=0,
                           bytes_accessed=bytes_accessed)

    q = pl.pallas_call(
        critic_kernel,
        out_shape=jax.ShapeDtypeStruct((B_pad, 2), jnp.float32),
        grid=grid,
        in_specs=in_specs,
        out_specs=out_specs,
        compiler_params=pltpu.CompilerParams(
            dimension_semantics=("parallel",),
            vmem_limit_bytes=32 * 1024 * 1024),
        cost_estimate=cost,
    )(state, action, *fused_params)

    return q[:B, 0:1], q[:B, 1:2]


# --------------------------------------------------------------------------- #
# Parameter construction (PyTorch nn.Linear-style init) + fusion
# --------------------------------------------------------------------------- #
def init_linear(key, fan_in, fan_out):
    """U(-1/sqrt(fan_in), 1/sqrt(fan_in)) for weight and bias.
    Weight is returned already transposed as (fan_in, fan_out)."""
    kw, kb = jax.random.split(key)
    bound = 1.0 / jnp.sqrt(jnp.float32(fan_in))
    w = jax.random.uniform(kw, (fan_in, fan_out), jnp.float32, -bound, bound)
    b = jax.random.uniform(kb, (1, fan_out), jnp.float32, -bound, bound)
    return w, b


def init_critic_raw_params(key, state_dim, action_dim, hidden=256):
    in_dim = state_dim + action_dim
    keys = jax.random.split(key, 6)
    w1, b1 = init_linear(keys[0], in_dim, hidden)
    w2, b2 = init_linear(keys[1], hidden, hidden)
    w3, b3 = init_linear(keys[2], hidden, 1)
    w4, b4 = init_linear(keys[3], in_dim, hidden)
    w5, b5 = init_linear(keys[4], hidden, hidden)
    w6, b6 = init_linear(keys[5], hidden, 1)
    return (w1, b1, w2, b2, w3, b3, w4, b4, w5, b5, w6, b6)


def fuse_critic_params(raw, weight_dtype=jnp.bfloat16):
    """Fuse the twin-head layer-1 weights and flatten the scalar output heads.

    Returns (w14, b14, w2, b2, w5, b5, w3r, w6r, b36) where
      w14: (in_dim, 512)  b14: (1, 512)
      w3r: (1, 256) row of l3,  w6r: (1, 256) row of l6  (kept f32, VPU path)
      b36: (1, 2) = [b3, b6]
    Matmul weights stored in `weight_dtype` (bf16 default: native MXU input);
    biases and the layer-3 rows stay f32.
    """
    (w1, b1, w2, b2, w3, b3, w4, b4, w5, b5, w6, b6) = raw
    w14 = jnp.concatenate([w1, w4], axis=1)            # (in_dim, 512)
    b14 = jnp.concatenate([b1, b4], axis=1)            # (1, 512)
    w3r = jnp.transpose(w3)                            # (1, 256)
    w6r = jnp.transpose(w6)                            # (1, 256)
    b36 = jnp.concatenate([b3, b6], axis=1)            # (1, 2)

    wdt = weight_dtype
    return (w14.astype(wdt), b14.astype(jnp.float32),
            w2.astype(wdt), b2.astype(jnp.float32),
            w5.astype(wdt), b5.astype(jnp.float32),
            w3r.astype(jnp.float32), w6r.astype(jnp.float32),
            b36.astype(jnp.float32))


# --------------------------------------------------------------------------- #
# Pure-JAX reference (mirrors the PyTorch module exactly)
# --------------------------------------------------------------------------- #
def critic_forward_ref(state, action, raw_params):
    sa = jnp.concatenate([state, action], axis=1)
    (w1, b1, w2, b2, w3, b3, w4, b4, w5, b5, w6, b6) = raw_params
    h = jnp.maximum(sa @ w1 + b1, 0.0)
    h = jnp.maximum(h @ w2 + b2, 0.0)
    q1 = h @ w3 + b3
    g = jnp.maximum(sa @ w4 + b4, 0.0)
    g = jnp.maximum(g @ w5 + b5, 0.0)
    q2 = g @ w6 + b6
    return q1, q2


# --------------------------------------------------------------------------- #
if __name__ == "__main__":
    key = jax.random.PRNGKey(0)
    k_state, k_action, k_params = jax.random.split(key, 3)

    batch = 8
    state_dim = 12
    action_dim = 4

    state = jax.random.normal(k_state, (batch, state_dim), jnp.float32)
    action = jax.random.normal(k_action, (batch, action_dim), jnp.float32)

    raw_params = init_critic_raw_params(k_params, state_dim, action_dim)
    q1_ref, q2_ref = critic_forward_ref(state, action, raw_params)

    # --- f32 weights: tight check of the fused-kernel semantics -------------
    fused_f32 = fuse_critic_params(raw_params, weight_dtype=jnp.float32)
    q1, q2 = critic_forward(state, action, fused_f32)
    jax.block_until_ready((q1, q2))
    assert q1.shape == (batch, 1) and q2.shape == (batch, 1)
    assert jnp.allclose(q1, q1_ref, atol=1e-4, rtol=1e-4)
    assert jnp.allclose(q2, q2_ref, atol=1e-4, rtol=1e-4)

    # --- bf16 weights (default): native MXU dtype on v5e/v6e/v7x ------------
    fused_bf16 = fuse_critic_params(raw_params)
    q1b, q2b = critic_forward(state, action, fused_bf16)
    jax.block_until_ready((q1b, q2b))
    assert jnp.allclose(q1b, q1_ref, atol=5e-2, rtol=5e-2)
    assert jnp.allclose(q2b, q2_ref, atol=5e-2, rtol=5e-2)

    # --- multi-tile grid path (>=2 grid steps, padded batch) ----------------
    b2_n = 40
    st2 = jax.random.normal(jax.random.PRNGKey(7), (b2_n, state_dim), jnp.float32)
    ac2 = jax.random.normal(jax.random.PRNGKey(9), (b2_n, action_dim), jnp.float32)
    q1m_ref, q2m_ref = critic_forward_ref(st2, ac2, raw_params)
    q1m, q2m = critic_forward(st2, ac2, fused_bf16)
    jax.block_until_ready((q1m, q2m))
    assert q1m.shape == (b2_n, 1) and q2m.shape == (b2_n, 1)
    assert jnp.allclose(q1m, q1m_ref, atol=5e-2, rtol=5e-2)
    assert jnp.allclose(q2m, q2m_ref, atol=5e-2, rtol=5e-2)

    # TODO(synk): the PyTorch module's Q1() method (single-head forward) is not
    # exposed as a separate kernel; reuse critic_forward and take q1 if needed.
    print("KERNEL_OK")
</pallas_src>

<mosaic_0001>
module attributes {stable_mosaic.version = 11 : i64} {
  func.func @critic_kernel(%arg0: i32, %arg1: memref<8x12xf32, #tpu.memory_space<vmem>>, %arg2: memref<8x4xf32, #tpu.memory_space<vmem>>, %arg3: memref<16x512xf32, #tpu.memory_space<vmem>>, %arg4: memref<1x512xf32, #tpu.memory_space<vmem>>, %arg5: memref<256x256xf32, #tpu.memory_space<vmem>>, %arg6: memref<1x256xf32, #tpu.memory_space<vmem>>, %arg7: memref<256x256xf32, #tpu.memory_space<vmem>>, %arg8: memref<1x256xf32, #tpu.memory_space<vmem>>, %arg9: memref<1x256xf32, #tpu.memory_space<vmem>>, %arg10: memref<1x256xf32, #tpu.memory_space<vmem>>, %arg11: memref<1x2xf32, #tpu.memory_space<vmem>>, %arg12: memref<8x2xf32, #tpu.memory_space<vmem>>) attributes {dimension_semantics = [#tpu.dimension_semantics<parallel>], iteration_bounds = array<i64: 1>, scalar_prefetch = 0 : i64, scratch_operands = 0 : i64, tpu.core_type = #tpu.core_type<tc>, window_params = [{transform_indices = @transform_0, window_bounds = array<i64: 8, 12>}, {transform_indices = @transform_1, window_bounds = array<i64: 8, 4>}, {pipeline_mode = #tpu.pipeline_mode<synchronous>, transform_indices = @transform_2, window_bounds = array<i64: 16, 512>}, {pipeline_mode = #tpu.pipeline_mode<synchronous>, transform_indices = @transform_3, window_bounds = array<i64: 1, 512>}, {pipeline_mode = #tpu.pipeline_mode<synchronous>, transform_indices = @transform_4, window_bounds = array<i64: 256, 256>}, {pipeline_mode = #tpu.pipeline_mode<synchronous>, transform_indices = @transform_5, window_bounds = array<i64: 1, 256>}, {pipeline_mode = #tpu.pipeline_mode<synchronous>, transform_indices = @transform_6, window_bounds = array<i64: 256, 256>}, {pipeline_mode = #tpu.pipeline_mode<synchronous>, transform_indices = @transform_7, window_bounds = array<i64: 1, 256>}, {pipeline_mode = #tpu.pipeline_mode<synchronous>, transform_indices = @transform_8, window_bounds = array<i64: 1, 256>}, {pipeline_mode = #tpu.pipeline_mode<synchronous>, transform_indices = @transform_9, window_bounds = array<i64: 1, 256>}, {pipeline_mode = #tpu.pipeline_mode<synchronous>, transform_indices = @transform_10, window_bounds = array<i64: 1, 2>}, {transform_indices = @transform_11, window_bounds = array<i64: 8, 2>}]} {
    %c0 = arith.constant 0 : index
    %c0_0 = arith.constant 0 : index
    %0 = vector.load %arg1[%c0, %c0_0] : memref<8x12xf32, #tpu.memory_space<vmem>>, vector<8x12xf32>
    %c0_1 = arith.constant 0 : index
    %c0_2 = arith.constant 0 : index
    %1 = vector.load %arg2[%c0_1, %c0_2] : memref<8x4xf32, #tpu.memory_space<vmem>>, vector<8x4xf32>
    %2 = tpu.concatenate %0, %1 in 1 : vector<8x12xf32>, vector<8x4xf32> -> vector<8x16xf32>
    %c0_3 = arith.constant 0 : index
    %c0_4 = arith.constant 0 : index
    %3 = vector.load %arg3[%c0_3, %c0_4] : memref<16x512xf32, #tpu.memory_space<vmem>>, vector<16x512xf32>
    %cst = arith.constant dense<0.000000e+00> : vector<8x512xf32>
    %4 = tpu.matmul %2, %3, %cst {dimension_numbers = #tpu.dot_dimension_numbers<[1], [0], [0], [1], [0, 0, 1, 1], [], []>} : vector<8x16xf32>, vector<16x512xf32>, vector<8x512xf32> -> vector<8x512xf32>
    %c0_5 = arith.constant 0 : index
    %c0_6 = arith.constant 0 : index
    %5 = vector.load %arg4[%c0_5, %c0_6] : memref<1x512xf32, #tpu.memory_space<vmem>>, vector<1x512xf32>
    %6 = vector.broadcast %5 : vector<1x512xf32> to vector<8x512xf32>
    %7 = arith.addf %4, %6 : vector<8x512xf32>
    %cst_7 = arith.constant 0.000000e+00 : f32
    %8 = vector.broadcast %cst_7 : f32 to vector<8x512xf32>
    %9 = arith.maximumf %7, %8 : vector<8x512xf32>
    %10 = vector.extract_strided_slice %9 {offsets = [0, 0], sizes = [8, 256], strides = [1, 1]} : vector<8x512xf32> to vector<8x256xf32>
    %11 = vector.extract_strided_slice %9 {offsets = [0, 256], sizes = [8, 256], strides = [1, 1]} : vector<8x512xf32> to vector<8x256xf32>
    %c0_8 = arith.constant 0 : index
    %c0_9 = arith.constant 0 : index
    %12 = vector.load %arg5[%c0_8, %c0_9] : memref<256x256xf32, #tpu.memory_space<vmem>>, vector<256x256xf32>
    %cst_10 = arith.constant dense<0.000000e+00> : vector<8x256xf32>
    %13 = tpu.matmul %10, %12, %cst_10 {dimension_numbers = #tpu.dot_dimension_numbers<[1], [0], [0], [1], [0, 0, 1, 1], [], []>} : vector<8x256xf32>, vector<256x256xf32>, vector<8x256xf32> -> vector<8x256xf32>
    %c0_11 = arith.constant 0 : index
    %c0_12 = arith.constant 0 : index
    %14 = vector.load %arg6[%c0_11, %c0_12] : memref<1x256xf32, #tpu.memory_space<vmem>>, vector<1x256xf32>
    %15 = vector.broadcast %14 : vector<1x256xf32> to vector<8x256xf32>
    %16 = arith.addf %13, %15 : vector<8x256xf32>
    %cst_13 = arith.constant 0.000000e+00 : f32
    %17 = vector.broadcast %cst_13 : f32 to vector<8x256xf32>
    %18 = arith.maximumf %16, %17 : vector<8x256xf32>
    %c0_14 = arith.constant 0 : index
    %c0_15 = arith.constant 0 : index
    %19 = vector.load %arg7[%c0_14, %c0_15] : memref<256x256xf32, #tpu.memory_space<vmem>>, vector<256x256xf32>
    %cst_16 = arith.constant dense<0.000000e+00> : vector<8x256xf32>
    %20 = tpu.matmul %11, %19, %cst_16 {dimension_numbers = #tpu.dot_dimension_numbers<[1], [0], [0], [1], [0, 0, 1, 1], [], []>} : vector<8x256xf32>, vector<256x256xf32>, vector<8x256xf32> -> vector<8x256xf32>
    %c0_17 = arith.constant 0 : index
    %c0_18 = arith.constant 0 : index
    %21 = vector.load %arg8[%c0_17, %c0_18] : memref<1x256xf32, #tpu.memory_space<vmem>>, vector<1x256xf32>
    %22 = vector.broadcast %21 : vector<1x256xf32> to vector<8x256xf32>
    %23 = arith.addf %20, %22 : vector<8x256xf32>
    %cst_19 = arith.constant 0.000000e+00 : f32
    %24 = vector.broadcast %cst_19 : f32 to vector<8x256xf32>
    %25 = arith.maximumf %23, %24 : vector<8x256xf32>
    %c0_20 = arith.constant 0 : index
    %c0_21 = arith.constant 0 : index
    %26 = vector.load %arg9[%c0_20, %c0_21] : memref<1x256xf32, #tpu.memory_space<vmem>>, vector<1x256xf32>
    %27 = vector.broadcast %26 : vector<1x256xf32> to vector<8x256xf32>
    %28 = arith.mulf %18, %27 : vector<8x256xf32>
    %cst_22 = arith.constant dense<0.000000e+00> : vector<8xf32>
    %29 = vector.multi_reduction <add>, %28, %cst_22 [1] : vector<8x256xf32> to vector<8xf32>
    %30 = vector.shape_cast %29 : vector<8xf32> to vector<8x1xf32>
    %c0_23 = arith.constant 0 : index
    %c0_24 = arith.constant 0 : index
    %31 = vector.load %arg10[%c0_23, %c0_24] : memref<1x256xf32, #tpu.memory_space<vmem>>, vector<1x256xf32>
    %32 = vector.broadcast %31 : vector<1x256xf32> to vector<8x256xf32>
    %33 = arith.mulf %25, %32 : vector<8x256xf32>
    %cst_25 = arith.constant dense<0.000000e+00> : vector<8xf32>
    %34 = vector.multi_reduction <add>, %33, %cst_25 [1] : vector<8x256xf32> to vector<8xf32>
    %35 = vector.shape_cast %34 : vector<8xf32> to vector<8x1xf32>
    %36 = tpu.concatenate %30, %35 in 1 : vector<8x1xf32>, vector<8x1xf32> -> vector<8x2xf32>
    %c0_26 = arith.constant 0 : index
    %c0_27 = arith.constant 0 : index
    %37 = vector.load %arg11[%c0_26, %c0_27] : memref<1x2xf32, #tpu.memory_space<vmem>>, vector<1x2xf32>
    %38 = vector.broadcast %37 : vector<1x2xf32> to vector<8x2xf32>
    %39 = arith.addf %36, %38 : vector<8x2xf32>
    %c0_28 = arith.constant 0 : index
    %c0_29 = arith.constant 0 : index
    %40 = vector.load %arg12[%c0_28, %c0_29] : memref<8x2xf32, #tpu.memory_space<vmem>>, vector<8x2xf32>
    tpu.vector_store %arg12[%c0_28, %c0_29], %39 {strides = array<i32>} : memref<8x2xf32, #tpu.memory_space<vmem>>, vector<8x2xf32>,
    return
  }
  func.func @transform_0(%arg0: i32) -> (i32, i32) {
    %c0_i32 = arith.constant 0 : i32
    %c0_i32_0 = arith.constant 0 : i32
    return %arg0, %c0_i32 : i32, i32
  }
  func.func @transform_1(%arg0: i32) -> (i32, i32) {
    %c0_i32 = arith.constant 0 : i32
    %c0_i32_0 = arith.constant 0 : i32
    return %arg0, %c0_i32 : i32, i32
  }
  func.func @transform_2(%arg0: i32) -> (i32, i32) {
    %c0_i32 = arith.constant 0 : i32
    %c0_i32_0 = arith.constant 0 : i32
    %c0_i32_1 = arith.constant 0 : i32
    return %c0_i32, %c0_i32_0 : i32, i32
  }
  func.func @transform_3(%arg0: i32) -> (i32, i32) {
    %c0_i32 = arith.constant 0 : i32
    %c0_i32_0 = arith.constant 0 : i32
    %c0_i32_1 = arith.constant 0 : i32
    return %c0_i32, %c0_i32_0 : i32, i32
  }
  func.func @transform_4(%arg0: i32) -> (i32, i32) {
    %c0_i32 = arith.constant 0 : i32
    %c0_i32_0 = arith.constant 0 : i32
    %c0_i32_1 = arith.constant 0 : i32
    return %c0_i32, %c0_i32_0 : i32, i32
  }
  func.func @transform_5(%arg0: i32) -> (i32, i32) {
    %c0_i32 = arith.constant 0 : i32
    %c0_i32_0 = arith.constant 0 : i32
    %c0_i32_1 = arith.constant 0 : i32
    return %c0_i32, %c0_i32_0 : i32, i32
  }
  func.func @transform_6(%arg0: i32) -> (i32, i32) {
    %c0_i32 = arith.constant 0 : i32
    %c0_i32_0 = arith.constant 0 : i32
    %c0_i32_1 = arith.constant 0 : i32
    return %c0_i32, %c0_i32_0 : i32, i32
  }
  func.func @transform_7(%arg0: i32) -> (i32, i32) {
    %c0_i32 = arith.constant 0 : i32
    %c0_i32_0 = arith.constant 0 : i32
    %c0_i32_1 = arith.constant 0 : i32
    return %c0_i32, %c0_i32_0 : i32, i32
  }
  func.func @transform_8(%arg0: i32) -> (i32, i32) {
    %c0_i32 = arith.constant 0 : i32
    %c0_i32_0 = arith.constant 0 : i32
    %c0_i32_1 = arith.constant 0 : i32
    return %c0_i32, %c0_i32_0 : i32, i32
  }
  func.func @transform_9(%arg0: i32) -> (i32, i32) {
    %c0_i32 = arith.constant 0 : i32
    %c0_i32_0 = arith.constant 0 : i32
    %c0_i32_1 = arith.constant 0 : i32
    return %c0_i32, %c0_i32_0 : i32, i32
  }
  func.func @transform_10(%arg0: i32) -> (i32, i32) {
    %c0_i32 = arith.constant 0 : i32
    %c0_i32_0 = arith.constant 0 : i32
    %c0_i32_1 = arith.constant 0 : i32
    return %c0_i32, %c0_i32_0 : i32, i32
  }
  func.func @transform_11(%arg0: i32) -> (i32, i32) {
    %c0_i32 = arith.constant 0 : i32
    %c0_i32_0 = arith.constant 0 : i32
    return %arg0, %c0_i32 : i32, i32
  }
}

</mosaic_0001>

<bundles_post_ra>
// kernel: tpu_custom_call.1
= control target key start
LH: loop header
LB: loop body
LE: loop exit
PB: predicated region body
PF: predicated region fallthrough
CT: control target
= control target key end

     0   :  { %16 = vsyncpa [#allocation3], 0  ;;  %s975_s0 = inlined_call_operand.vmem [shape: f32[8,12], index: 0, kind: input, shape index: {}]   ;;  %s976_s1 = inlined_call_operand.vmem [shape: f32[8,4], index: 1, kind: input, shape index: {}]   ;;  %s977_s2 = inlined_call_operand.hbm [shape: f32[16,512], index: 2, kind: input, shape index: {}]   ;;  %s978_s3 = inlined_call_operand.vmem [shape: f32[1,512], index: 3, kind: input, shape index: {}]   ;;  %s979_s4 = inlined_call_operand.hbm [shape: f32[256,256], index: 4, kind: input, shape index: {}]   ;;  %s980_s5 = inlined_call_operand.vmem [shape: f32[1,256], index: 5, kind: input, shape index: {}]   ;;  %s981_s6 = inlined_call_operand.hbm [shape: f32[256,256], index: 6, kind: input, shape index: {}]   ;;  %s982_s7 = inlined_call_operand.vmem [shape: f32[1,256], index: 7, kind: input, shape index: {}]   ;;  %s983_s8 = inlined_call_operand.vmem [shape: f32[1,256], index: 8, kind: input, shape index: {}]   ;;  %s984_s9 = inlined_call_operand.vmem [shape: f32[1,256], index: 9, kind: input, shape index: {}]   ;;  %s985_s10 = inlined_call_operand.vmem [shape: f32[1,2], index: 10, kind: input, shape index: {}]   ;;  %s986_s11 = inlined_call_operand.vmem [shape: f32[8,2], index: 11, kind: output, shape index: {}]  }
   0x1   :  { %17 = vsyncpa [#allocation5], 0  ;;  %s835_s17 = smov [#allocation4]   ;;  %s765_s21 = scalar_lea.hbm %s979_s4, 8192 }
   0x2   :  { %s41_s18 = sshll.u32 %s835_s17, 4  ;;  %p766_p0 = scmp.ne.s32.totalorder %s979_s4, %s765_s21  ;;  %s42_s18 = int_to_ptr.vmem [resolvable:$true] %s41_s18 }
   0x3   :  { %p769_p1 = scmp.lt.u32.totalorder %s765_s21, %s979_s4 }
   0x5   :  { %p771_p2 = pnand %p769_p1, %p766_p0 }
   0x7   :  { %774 = shalt.err (!%p771_p2)
}
   0x8   :  { %s775_s26 = scalar_lea.vmem %s42_s18, 8192  ;;  %p780_p4 = scmp.lt.s32.totalorder %s42_s18, %s42_s18 }
   0x9   :  { %p776_p3 = scmp.ne.s32.totalorder %s42_s18, %s775_s26  ;;  %p781_p5 = scmp.lt.s32.totalorder %s775_s26, %s775_s26 }
   0xb   :  { %p782_p6 = por %p781_p5, %p780_p4 }
   0xd   :  { %p783_p7 = pnand %p782_p6, %p776_p3 }
   0xf   :  { %786 = shalt.err (!%p783_p7)
}
  0x10   :  { %s836_s27 = smov 256   ;;  %s837_s28 = smov 16  }
  0x11   :  { %47 = dma.hbm_to_vmem [thread:$0]  %s979_s4, 8192, %s42_s18, [#allocation5], %s836_s27, %s836_s27, %s837_s28  }
  0x12   :  { %s838_s12 = smov [#allocation2]   ;;  %s787_s16 = scalar_lea.hbm %s977_s2, 1024 }
  0x13   :  { %s27_s13 = sshll.u32 %s838_s12, 4  ;;  %p788_p8 = scmp.ne.s32.totalorder %s977_s2, %s787_s16  ;;  %s28_s13 = int_to_ptr.vmem [resolvable:$true] %s27_s13 }
  0x14   :  { %p791_p9 = scmp.lt.u32.totalorder %s787_s16, %s977_s2 }
  0x16   :  { %p793_p10 = pnand %p791_p9, %p788_p8 }
  0x18   :  { %796 = shalt.err (!%p793_p10)
}
  0x19   :  { %s797_s22 = scalar_lea.vmem %s28_s13, 1024  ;;  %p802_p12 = scmp.lt.s32.totalorder %s28_s13, %s28_s13 }
  0x1a   :  { %p798_p11 = scmp.ne.s32.totalorder %s28_s13, %s797_s22  ;;  %p803_p13 = scmp.lt.s32.totalorder %s797_s22, %s797_s22 }
  0x1c   :  { %p804_p0 = por %p803_p13, %p802_p12 }
  0x1e   :  { %p805_p1 = pnand %p804_p0, %p798_p11 }
  0x20   :  { %808 = shalt.err (!%p805_p1)
}
  0x21   :  { %s839_s4 = smov 512   ;;  %s840_s18 = smov 32  }
  0x22   :  { %33 = dma.hbm_to_vmem [thread:$0]  %s977_s2, 1024, %s28_s13, [#allocation3], %s839_s4, %s839_s4, %s840_s18  }
  0x23   :  { %s841_s25 = smov [#allocation6]   ;;  %s809_s12 = scalar_lea.hbm %s981_s6, 8192 }
  0x24   :  { %s55_s26 = sshll.u32 %s841_s25, 4  ;;  %p810_p2 = scmp.ne.s32.totalorder %s981_s6, %s809_s12  ;;  %s56_s26 = int_to_ptr.vmem [resolvable:$true] %s55_s26 }
  0x25   :  { %p813_p3 = scmp.lt.u32.totalorder %s809_s12, %s981_s6 }
  0x27   :  { %p815_p4 = pnand %p813_p3, %p810_p2 }
  0x29   :  { %818 = shalt.err (!%p815_p4)
}
  0x2a   :  { %s819_s19 = scalar_lea.vmem %s56_s26, 8192  ;;  %p824_p6 = scmp.lt.s32.totalorder %s56_s26, %s56_s26 }
  0x2b   :  { %p820_p5 = scmp.ne.s32.totalorder %s56_s26, %s819_s19  ;;  %p825_p7 = scmp.lt.s32.totalorder %s819_s19, %s819_s19 }
  0x2d   :  { %p826_p8 = por %p825_p7, %p824_p6 }
  0x2f   :  { %p827_p9 = pnand %p826_p8, %p820_p5 }
  0x31   :  { %830 = shalt.err (!%p827_p9)
}
  0x32   :  { %61 = dma.hbm_to_vmem [thread:$0]  %s981_s6, 8192, %s56_s26, [#allocation5], %s836_s27, %s836_s27, %s837_s28  }
  0x33   :  { %831 = dma.done.wait [#allocation3], 1024  }
  0x34   :  { %832 = vsyncadd [#allocation3], 4294966272 }
  0x35   :  { %833 = dma.done.wait [#allocation5], 16384  }
  0x36   :  { %834 = vsyncadd [#allocation5], 4294950912  ;;  %v842_v0 = vmov 0.0   ;;  %v80_v1 = vld [vmem:[%s976_s1] sm:$0xff]  ;;  %v88_v2 = vld [vmem:[#allocation2 + $0x8] sm:$0xff]  ;;  %s843_s22 = smov 12  }
  0x37   :  { %185 = vmatprep.mubr.f32.mxu0 %v842_v0  ;;  %256 = vmatprep.mubr.f32.mxu1 %v842_v0  ;;  %v92_v3 = vld [vmem:[#allocation2 + $0x28] sm:$0xff]  ;;  %v90_v5 = vld [vmem:[#allocation2 + $0x18] sm:$0xff]  ;;  %v87_v7 = vld [vmem:[#allocation2] sm:$0xff]  ;;  %vm85_vm0 = vcmask 97280   ;;  %vm117_vm1 = vcmask 130048   ;;  %vm599_vm2 = vcmask 7168  }
  0x38   :  { %82 = vrot.lane.b32.xlu0 %v80_v1, %s843_s22  ;;  %v620_v4 = vpack.c.bf16 %v92_v3, %v88_v2  ;;  %v94_v6 = vld [vmem:[#allocation2 + $0x38] sm:$0xff]  ;;  %v91_v9 = vld [vmem:[#allocation2 + $0x20] sm:$0xff]  ;;  %v89_v10 = vld [vmem:[#allocation2 + $0x10] sm:$0xff]  ;;  %vm609_vm3 = vcmask 15360  }
  0x39   :  { %v624_v8 = vpack.c.bf16 %v94_v6, %v90_v5  ;;  %v93_v11 = vld [vmem:[#allocation2 + $0x30] sm:$0xff]  ;;  %v622_v12 = vpack.c.bf16 %v91_v9, %v87_v7  ;;  %v268_v14 = vld [vmem:[#allocation4 + $0x8] sm:$0xff]  ;;  %v270_v15 = vld [vmem:[#allocation4 + $0x18] sm:$0xff] }
  0x3a   :  { %621 = vmatprep.subr.bf16.mxu0 %v620_v4  ;;  %v626_v13 = vpack.c.bf16 %v93_v11, %v89_v10  ;;  %v628_v16 = vpack.c.bf16 %v270_v15, %v268_v14  ;;  %v417_v17 = vld [vmem:[#allocation6 + $0x8] sm:$0xff]  ;;  %v419_v18 = vld [vmem:[#allocation6 + $0x18] sm:$0xff]  ;;  %v267_v20 = vld [vmem:[#allocation4] sm:$0xff] }
  0x3b   :  { %625 = vmatprep.subr.bf16.mxu1 %v624_v8  ;;  %623 = vmatpush1.bf16.msra.mxu0 %v622_v12  ;;  %v692_v19 = vpack.c.bf16 %v419_v18, %v417_v17  ;;  %v269_v21 = vld [vmem:[#allocation4 + $0x10] sm:$0xff]  ;;  %v416_v22 = vld [vmem:[#allocation6] sm:$0xff]  ;;  %v272_v24 = vld [vmem:[#allocation4 + $0x28] sm:$0xff] }
  0x3c   :  { %627 = vmatpush1.bf16.msra.mxu1 %v626_v13  ;;  %629 = vmatprep.subr.bf16.mxu0 %v628_v16  ;;  %v418_v23 = vld [vmem:[#allocation6 + $0x10] sm:$0xff]  ;;  %v274_v25 = vld [vmem:[#allocation4 + $0x38] sm:$0xff]  ;;  %v421_v26 = vld [vmem:[#allocation6 + $0x28] sm:$0xff]  ;;  %v630_v29 = vpack.c.bf16 %v269_v21, %v267_v20 }
  0x3d   :  { %693 = vmatprep.subr.bf16.mxu1 %v692_v19  ;;  %v423_v27 = vld [vmem:[#allocation6 + $0x38] sm:$0xff]  ;;  %v79_v28 = vld [vmem:[%s975_s0] sm:$0xff]  ;;  %v694_v30 = vpack.c.bf16 %v418_v23, %v416_v22  ;;  %v273_v32 = vld [vmem:[#allocation4 + $0x30] sm:$0xff]  ;;  %v632_v34 = vpack.c.bf16 %v274_v25, %v272_v24 }
  0x3e   :  { %v271_v31 = vld [vmem:[#allocation4 + $0x20] sm:$0xff]  ;;  %v696_v35 = vpack.c.bf16 %v423_v27, %v421_v26  ;;  %v422_v37 = vld [vmem:[#allocation6 + $0x30] sm:$0xff]  ;;  %v276_v38 = vld [vmem:[#allocation4 + $0x48] sm:$0xff] }
  0x3f   :  { %v420_v36 = vld [vmem:[#allocation6 + $0x20] sm:$0xff]  ;;  %v278_v40 = vld [vmem:[#allocation4 + $0x58] sm:$0xff]  ;;  %v425_v41 = vld [vmem:[#allocation6 + $0x48] sm:$0xff]  ;;  %v634_v43 = vpack.c.bf16 %v273_v32, %v271_v31 }
  0x40   :  { %v427_v42 = vld [vmem:[#allocation6 + $0x58] sm:$0xff]  ;;  %v698_v44 = vpack.c.bf16 %v422_v37, %v420_v36  ;;  %v275_v45 = vld [vmem:[#allocation4 + $0x40] sm:$0xff]  ;;  %v277_v46 = vld [vmem:[#allocation4 + $0x50] sm:$0xff]  ;;  %v636_v47 = vpack.c.bf16 %v278_v40, %v276_v38 }
  0x41   :  { %v700_v48 = vpack.c.bf16 %v427_v42, %v425_v41  ;;  %v424_v49 = vld [vmem:[#allocation6 + $0x40] sm:$0xff]  ;;  %v426_v50 = vld [vmem:[#allocation6 + $0x50] sm:$0xff]  ;;  %v280_v51 = vld [vmem:[#allocation4 + $0x68] sm:$0xff]  ;;  %v638_v55 = vpack.c.bf16 %v277_v46, %v275_v45 }
  0x42   :  { %v282_v52 = vld [vmem:[#allocation4 + $0x78] sm:$0xff]  ;;  %v429_v53 = vld [vmem:[#allocation6 + $0x68] sm:$0xff]  ;;  %v702_v56 = vpack.c.bf16 %v426_v50, %v424_v49  ;;  %v279_v57 = vld [vmem:[#allocation4 + $0x60] sm:$0xff] }
  0x43   :  { %v431_v54 = vld [vmem:[#allocation6 + $0x78] sm:$0xff]  ;;  %v281_v58 = vld [vmem:[#allocation4 + $0x70] sm:$0xff]  ;;  %v640_v59 = vpack.c.bf16 %v282_v52, %v280_v51  ;;  %v428_v61 = vld [vmem:[#allocation6 + $0x60] sm:$0xff] }
  0x44   :  { %v704_v60 = vpack.c.bf16 %v431_v54, %v429_v53  ;;  %v430_v62 = vld [vmem:[#allocation6 + $0x70] sm:$0xff]  ;;  %v284_v63 = vld [vmem:[#allocation4 + $0x88] sm:$0xff]  ;;  %v286_v0 = vld [vmem:[#allocation4 + $0x98] sm:$0xff]  ;;  %v642_v3 = vpack.c.bf16 %v281_v58, %v279_v57 }
  0x45   :  { %v433_v1 = vld [vmem:[#allocation6 + $0x88] sm:$0xff]  ;;  %v435_v2 = vld [vmem:[#allocation6 + $0x98] sm:$0xff]  ;;  %v706_v4 = vpack.c.bf16 %v430_v62, %v428_v61  ;;  %v283_v5 = vld [vmem:[#allocation4 + $0x80] sm:$0xff]  ;;  %v644_v7 = vpack.c.bf16 %v286_v0, %v284_v63 }
  0x46   :  { %v285_v6 = vld [vmem:[#allocation4 + $0x90] sm:$0xff]  ;;  %v708_v8 = vpack.c.bf16 %v435_v2, %v433_v1  ;;  %v432_v9 = vld [vmem:[#allocation6 + $0x80] sm:$0xff]  ;;  %v288_v11 = vld [vmem:[#allocation4 + $0xa8] sm:$0xff] }
  0x47   :  { %v434_v10 = vld [vmem:[#allocation6 + $0x90] sm:$0xff]  ;;  %v290_v12 = vld [vmem:[#allocation4 + $0xb8] sm:$0xff]  ;;  %v437_v13 = vld [vmem:[#allocation6 + $0xa8] sm:$0xff]  ;;  %v646_v15 = vpack.c.bf16 %v285_v6, %v283_v5 }
  0x48   :  { %v439_v14 = vld [vmem:[#allocation6 + $0xb8] sm:$0xff]  ;;  %v710_v16 = vpack.c.bf16 %v434_v10, %v432_v9  ;;  %v287_v17 = vld [vmem:[#allocation4 + $0xa0] sm:$0xff]  ;;  %v289_v18 = vld [vmem:[#allocation4 + $0xb0] sm:$0xff]  ;;  %v648_v19 = vpack.c.bf16 %v290_v12, %v288_v11 }
  0x49   :  { %v712_v20 = vpack.c.bf16 %v439_v14, %v437_v13  ;;  %v436_v21 = vld [vmem:[#allocation6 + $0xa0] sm:$0xff]  ;;  %v438_v22 = vld [vmem:[#allocation6 + $0xb0] sm:$0xff]  ;;  %v292_v23 = vld [vmem:[#allocation4 + $0xc8] sm:$0xff]  ;;  %v650_v27 = vpack.c.bf16 %v289_v18, %v287_v17 }
  0x4a   :  { %v294_v24 = vld [vmem:[#allocation4 + $0xd8] sm:$0xff]  ;;  %v441_v25 = vld [vmem:[#allocation6 + $0xc8] sm:$0xff]  ;;  %v295_v41 = vld [vmem:[#allocation4 + $0xe0] sm:$0xff] }
  0x4b   :  { %v443_v26 = vld [vmem:[#allocation6 + $0xd8] sm:$0xff]  ;;  %v652_v31 = vpack.c.bf16 %v294_v24, %v292_v23  ;;  %v445_v37 = vld [vmem:[#allocation6 + $0xe8] sm:$0xff]  ;;  %v297_v42 = vld [vmem:[#allocation4 + $0xf0] sm:$0xff] }
  0x4c   :  { %v716_v32 = vpack.c.bf16 %v443_v26, %v441_v25  ;;  %v298_v36 = vld [vmem:[#allocation4 + $0xf8] sm:$0xff]  ;;  %v444_v45 = vld [vmem:[#allocation6 + $0xe0] sm:$0xff]  ;;  %v446_v46 = vld [vmem:[#allocation6 + $0xf0] sm:$0xff]  ;;  %v658_v51 = vpack.c.bf16 %v297_v42, %v295_v41 }
  0x4d   :  { %v447_v38 = vld [vmem:[#allocation6 + $0xf8] sm:$0xff]  ;;  %v449_v49 = vld [vmem:[#allocation6 + $0x108] sm:$0xff]  ;;  %v722_v52 = vpack.c.bf16 %v446_v46, %v444_v45  ;;  %v299_v53 = vld [vmem:[#allocation4 + $0x100] sm:$0xff] }
  0x4e   :  { %v451_v50 = vld [vmem:[#allocation6 + $0x118] sm:$0xff]  ;;  %v301_v54 = vld [vmem:[#allocation4 + $0x110] sm:$0xff]  ;;  %v448_v57 = vld [vmem:[#allocation6 + $0x100] sm:$0xff] }
  0x4f   :  { %v450_v58 = vld [vmem:[#allocation6 + $0x110] sm:$0xff]  ;;  %v453_v61 = vld [vmem:[#allocation6 + $0x128] sm:$0xff]  ;;  %v455_v62 = vld [vmem:[#allocation6 + $0x138] sm:$0xff]  ;;  %v662_v63 = vpack.c.bf16 %v301_v54, %v299_v53 }
  0x50   :  { %v726_v0 = vpack.c.bf16 %v450_v58, %v448_v57  ;;  %v303_v1 = vld [vmem:[#allocation4 + $0x120] sm:$0xff]  ;;  %v305_v2 = vld [vmem:[#allocation4 + $0x130] sm:$0xff]  ;;  %v457_v9 = vld [vmem:[#allocation6 + $0x148] sm:$0xff] }
  0x51   :  { %v452_v5 = vld [vmem:[#allocation6 + $0x120] sm:$0xff]  ;;  %v454_v6 = vld [vmem:[#allocation6 + $0x130] sm:$0xff]  ;;  %v459_v10 = vld [vmem:[#allocation6 + $0x158] sm:$0xff]  ;;  %v666_v11 = vpack.c.bf16 %v305_v2, %v303_v1 }
  0x52   :  { %v730_v12 = vpack.c.bf16 %v454_v6, %v452_v5  ;;  %v307_v13 = vld [vmem:[#allocation4 + $0x140] sm:$0xff]  ;;  %v309_v14 = vld [vmem:[#allocation4 + $0x150] sm:$0xff]  ;;  %v469_v45 = vld [vmem:[#allocation6 + $0x1a8] sm:$0xff] }
  0x53   :  { %v456_v17 = vld [vmem:[#allocation6 + $0x140] sm:$0xff]  ;;  %v458_v18 = vld [vmem:[#allocation6 + $0x150] sm:$0xff]  ;;  %v670_v23 = vpack.c.bf16 %v309_v14, %v307_v13  ;;  %v471_v46 = vld [vmem:[#allocation6 + $0x1b8] sm:$0xff] }
  0x54   :  { %v734_v24 = vpack.c.bf16 %v458_v18, %v456_v17  ;;  %v311_v25 = vld [vmem:[#allocation4 + $0x160] sm:$0xff]  ;;  %v313_v26 = vld [vmem:[#allocation4 + $0x170] sm:$0xff]  ;;  %v473_v57 = vld [vmem:[#allocation6 + $0x1c8] sm:$0xff]  ;;  %v97_v17 = vlaneseq }
  0x55   :  { %v464_v41 = vld [vmem:[#allocation6 + $0x180] sm:$0xff]  ;;  %v466_v42 = vld [vmem:[#allocation6 + $0x190] sm:$0xff]  ;;  %v475_v58 = vld [vmem:[#allocation6 + $0x1d8] sm:$0xff] }
  0x56   :  { %v468_v53 = vld [vmem:[#allocation6 + $0x1a0] sm:$0xff]  ;;  %v470_v54 = vld [vmem:[#allocation6 + $0x1b0] sm:$0xff]  ;;  %v328_v5 = vld [vmem:[#allocation4 + $0x1e8] sm:$0xff]  ;;  %v98_v18 = vshrl.u32 %v97_v17, 7 }
  0x57   :  { %v472_v1 = vld [vmem:[#allocation6 + $0x1c0] sm:$0xff]  ;;  %v330_v6 = vld [vmem:[#allocation4 + $0x1f8] sm:$0xff] }
  0x58   :  { %v476_v14 = vld [vmem:[#allocation6 + $0x1e0] sm:$0xff] }
  0xaa   :  { %v83_v33 = vpop.permute.xlu0 %82 }
  0xab   :  { %v86_v39 = vsel %vm85_vm0, %v79_v28, %v83_v33  ;;  %v714_v28 = vpack.c.bf16 %v438_v22, %v436_v21  ;;  %v440_v33 = vld [vmem:[#allocation6 + $0xc0] sm:$0xff]  ;;  %v461_v21 = vld [vmem:[#allocation6 + $0x168] sm:$0xff]  ;;  %v463_v22 = vld [vmem:[#allocation6 + $0x178] sm:$0xff] }
  0xac   :  { %617 = vmatmul.mubr.msk.f32.vlgmr.msra.gmra.mrb[0].mxu0 %vm117_vm1, %v86_v39  ;;  %618 = vmatmul.mubr.msk.f32.vlgmr.msra.gmra.mrb[0].mxu1 %vm117_vm1, %v86_v39 }
  0xad   :  { %631 = vmatpush1.bf16.msra.mxu0 %v630_v29  ;;  %695 = vmatpush1.bf16.msra.mxu1 %v694_v30  ;;  %v291_v29 = vld [vmem:[#allocation4 + $0xc0] sm:$0xff]  ;;  %v293_v30 = vld [vmem:[#allocation4 + $0xd0] sm:$0xff] }
  0xae   :  { %633 = vmatprep.subr.bf16.mxu0 %v632_v34  ;;  %697 = vmatprep.subr.bf16.mxu1 %v696_v35  ;;  %v442_v34 = vld [vmem:[#allocation6 + $0xd0] sm:$0xff]  ;;  %v296_v35 = vld [vmem:[#allocation4 + $0xe8] sm:$0xff]  ;;  %v654_v39 = vpack.c.bf16 %v293_v30, %v291_v29  ;;  %v460_v29 = vld [vmem:[#allocation6 + $0x160] sm:$0xff] }
  0xaf   :  { %v718_v40 = vpack.c.bf16 %v442_v34, %v440_v33  ;;  %v462_v30 = vld [vmem:[#allocation6 + $0x170] sm:$0xff]  ;;  %v465_v33 = vld [vmem:[#allocation6 + $0x188] sm:$0xff]  ;;  %v467_v34 = vld [vmem:[#allocation6 + $0x198] sm:$0xff] }
  0xb1   :  { %635 = vmatpush1.bf16.msra.mxu0 %v634_v43  ;;  %699 = vmatpush1.bf16.msra.mxu1 %v698_v44  ;;  %v656_v43 = vpack.c.bf16 %v298_v36, %v296_v35  ;;  %v720_v44 = vpack.c.bf16 %v447_v38, %v445_v37  ;;  %v674_v35 = vpack.c.bf16 %v313_v26, %v311_v25  ;;  %v315_v37 = vld [vmem:[#allocation4 + $0x180] sm:$0xff]  ;;  %v317_v38 = vld [vmem:[#allocation4 + $0x190] sm:$0xff] }
  0xb2   :  { %637 = vmatprep.subr.bf16.mxu0 %v636_v47  ;;  %701 = vmatprep.subr.bf16.mxu1 %v700_v48  ;;  %v300_v47 = vld [vmem:[#allocation4 + $0x108] sm:$0xff]  ;;  %v302_v48 = vld [vmem:[#allocation4 + $0x118] sm:$0xff]  ;;  %v738_v36 = vpack.c.bf16 %v462_v30, %v460_v29 }
  0xb5   :  { %639 = vmatpush1.bf16.msra.mxu0 %v638_v55  ;;  %703 = vmatpush1.bf16.msra.mxu1 %v702_v56  ;;  %v660_v55 = vpack.c.bf16 %v302_v48, %v300_v47  ;;  %v724_v56 = vpack.c.bf16 %v451_v50, %v449_v49  ;;  %v678_v47 = vpack.c.bf16 %v317_v38, %v315_v37  ;;  %v319_v49 = vld [vmem:[#allocation4 + $0x1a0] sm:$0xff]  ;;  %v321_v50 = vld [vmem:[#allocation4 + $0x1b0] sm:$0xff] }
  0xb6   :  { %641 = vmatprep.subr.bf16.mxu0 %v640_v59  ;;  %705 = vmatprep.subr.bf16.mxu1 %v704_v60  ;;  %v304_v59 = vld [vmem:[#allocation4 + $0x128] sm:$0xff]  ;;  %v306_v60 = vld [vmem:[#allocation4 + $0x138] sm:$0xff]  ;;  %v742_v48 = vpack.c.bf16 %v466_v42, %v464_v41  ;;  %v480_v41 = vld [vmem:[%s982_s7] sm:$0x3] }
  0xb9   :  { %643 = vmatpush1.bf16.msra.mxu0 %v642_v3  ;;  %707 = vmatpush1.bf16.msra.mxu1 %v706_v4  ;;  %v664_v3 = vpack.c.bf16 %v306_v60, %v304_v59  ;;  %v728_v4 = vpack.c.bf16 %v455_v62, %v453_v61  ;;  %v682_v59 = vpack.c.bf16 %v321_v50, %v319_v49 }
  0xba   :  { %645 = vmatprep.subr.bf16.mxu0 %v644_v7  ;;  %709 = vmatprep.subr.bf16.mxu1 %v708_v8  ;;  %v308_v7 = vld [vmem:[#allocation4 + $0x148] sm:$0xff]  ;;  %v310_v8 = vld [vmem:[#allocation4 + $0x158] sm:$0xff]  ;;  %v746_v60 = vpack.c.bf16 %v470_v54, %v468_v53  ;;  %v748_v62 = vpack.c.bf16 %v475_v58, %v473_v57 }
  0xbd   :  { %647 = vmatpush1.bf16.msra.mxu0 %v646_v15  ;;  %711 = vmatpush1.bf16.msra.mxu1 %v710_v16  ;;  %v668_v15 = vpack.c.bf16 %v310_v8, %v308_v7  ;;  %v732_v16 = vpack.c.bf16 %v459_v10, %v457_v9  ;;  %v477_v7 = vld [vmem:[#allocation6 + $0x1e8] sm:$0xff]  ;;  %v688_v8 = vpack.c.bf16 %v330_v6, %v328_v5  ;;  %v479_v9 = vld [vmem:[#allocation6 + $0x1f8] sm:$0xff]  ;;  %v327_v10 = vld [vmem:[#allocation4 + $0x1e0] sm:$0xff] }
  0xbe   :  { %649 = vmatprep.subr.bf16.mxu0 %v648_v19  ;;  %713 = vmatprep.subr.bf16.mxu1 %v712_v20  ;;  %v312_v19 = vld [vmem:[#allocation4 + $0x168] sm:$0xff]  ;;  %v314_v20 = vld [vmem:[#allocation4 + $0x178] sm:$0xff]  ;;  %v619_v6 = vld [vmem:[%s985_s10] ss:$0 sm:$0xff] }
  0xc1   :  { %651 = vmatpush1.bf16.msra.mxu0 %v650_v27  ;;  %715 = vmatpush1.bf16.msra.mxu1 %v714_v28  ;;  %v672_v27 = vpack.c.bf16 %v314_v20, %v312_v19  ;;  %v736_v28 = vpack.c.bf16 %v463_v22, %v461_v21  ;;  %v99_v19 = vsub.s32 0, %v98_v18  ;;  %v107_v20 = vsub.s32 2, %v98_v18  ;;  %v95_v21 = vld [vmem:[%s978_s3] sm:$0xf] }
  0xc2   :  { %653 = vmatprep.subr.bf16.mxu0 %v652_v31  ;;  %717 = vmatprep.subr.bf16.mxu1 %v716_v32  ;;  %v316_v31 = vld [vmem:[#allocation4 + $0x188] sm:$0xff]  ;;  %v318_v32 = vld [vmem:[#allocation4 + $0x198] sm:$0xff]  ;;  %v103_v22 = vsub.s32 1, %v98_v18 }
  0xc3   :  { %v108_v25 = vrot.slane %v95_v21, %v107_v20 }
  0xc4   :  { %v104_v26 = vrot.slane %v95_v21, %v103_v22 }
  0xc5   :  { %655 = vmatpush1.bf16.msra.mxu0 %v654_v39  ;;  %719 = vmatpush1.bf16.msra.mxu1 %v718_v40  ;;  %v676_v39 = vpack.c.bf16 %v318_v32, %v316_v31  ;;  %v740_v40 = vpack.c.bf16 %v467_v34, %v465_v33 }
  0xc6   :  { %657 = vmatprep.subr.bf16.mxu0 %v656_v43  ;;  %721 = vmatprep.subr.bf16.mxu1 %v720_v44  ;;  %v320_v43 = vld [vmem:[#allocation4 + $0x1a8] sm:$0xff]  ;;  %v322_v44 = vld [vmem:[#allocation4 + $0x1b8] sm:$0xff] }
  0xc9   :  { %659 = vmatpush1.bf16.msra.mxu0 %v658_v51  ;;  %723 = vmatpush1.bf16.msra.mxu1 %v722_v52  ;;  %v680_v51 = vpack.c.bf16 %v322_v44, %v320_v43  ;;  %v744_v52 = vpack.c.bf16 %v471_v46, %v469_v45  ;;  %v485_v43 = vrot.slane %v480_v41, %v99_v19  ;;  %v565_v44 = vld [vmem:[%s983_s8] sm:$0x3] }
  0xca   :  { %661 = vmatprep.subr.bf16.mxu0 %v660_v55  ;;  %725 = vmatprep.subr.bf16.mxu1 %v724_v56  ;;  %v324_v55 = vld [vmem:[#allocation4 + $0x1c8] sm:$0xff]  ;;  %v326_v56 = vld [vmem:[#allocation4 + $0x1d8] sm:$0xff]  ;;  %v489_v46 = vrot.slane %v480_v41, %v103_v22  ;;  %v574_v57 = vrot.slane %v565_v44, %v103_v22 }
  0xcb   :  { %v684_v61 = vpack.c.bf16 %v326_v56, %v324_v55 }
  0xcd   :  { %663 = vmatpush1.bf16.msra.mxu0 %v662_v63  ;;  %727 = vmatpush1.bf16.msra.mxu1 %v726_v0  ;;  %v323_v63 = vld [vmem:[#allocation4 + $0x1c0] sm:$0xff]  ;;  %v325_v0 = vld [vmem:[#allocation4 + $0x1d0] sm:$0xff] }
  0xce   :  { %665 = vmatprep.subr.bf16.mxu0 %v664_v3  ;;  %729 = vmatprep.subr.bf16.mxu1 %v728_v4  ;;  %v686_v2 = vpack.c.bf16 %v325_v0, %v323_v63  ;;  %v474_v3 = vld [vmem:[#allocation6 + $0x1d0] sm:$0xff] }
  0xcf   :  { %v750_v4 = vpack.c.bf16 %v474_v3, %v472_v1 }
  0xd1   :  { %667 = vmatpush1.bf16.msra.mxu0 %v666_v11  ;;  %731 = vmatpush1.bf16.msra.mxu1 %v730_v12  ;;  %v329_v11 = vld [vmem:[#allocation4 + $0x1f0] sm:$0xff]  ;;  %v752_v12 = vpack.c.bf16 %v479_v9, %v477_v7 }
  0xd2   :  { %669 = vmatprep.subr.bf16.mxu0 %v668_v15  ;;  %733 = vmatprep.subr.bf16.mxu1 %v732_v16  ;;  %v690_v13 = vpack.c.bf16 %v329_v11, %v327_v10  ;;  %v478_v15 = vld [vmem:[#allocation6 + $0x1f0] sm:$0xff] }
  0xd3   :  { %v754_v16 = vpack.c.bf16 %v478_v15, %v476_v14 }
  0xd5   :  { %671 = vmatpush1.bf16.msra.mxu0 %v670_v23  ;;  %735 = vmatpush1.bf16.msra.mxu1 %v734_v24  ;;  %v111_v23 = vsub.s32 3, %v98_v18  ;;  %v100_v24 = vrot.slane %v95_v21, %v99_v19 }
  0xd6   :  { %673 = vmatprep.subr.bf16.mxu0 %v672_v27  ;;  %737 = vmatprep.subr.bf16.mxu1 %v736_v28 }
  0xd7   :  { %v112_v27 = vrot.slane %v95_v21, %v111_v23 }
  0xd9   :  { %675 = vmatpush1.bf16.msra.mxu0 %v674_v35  ;;  %739 = vmatpush1.bf16.msra.mxu1 %v738_v36 }
  0xda   :  { %677 = vmatprep.subr.bf16.mxu0 %v676_v39  ;;  %741 = vmatprep.subr.bf16.mxu1 %v740_v40  ;;  %v331_v40 = vld [vmem:[%s980_s5] sm:$0x3] }
  0xdb   :  { %v336_v42 = vrot.slane %v331_v40, %v99_v19  ;;  %v340_v45 = vrot.slane %v331_v40, %v103_v22 }
  0xdd   :  { %679 = vmatpush1.bf16.msra.mxu0 %v678_v47  ;;  %743 = vmatpush1.bf16.msra.mxu1 %v742_v48  ;;  %v582_v47 = vld [vmem:[%s984_s9] sm:$0x3] }
  0xde   :  { %681 = vmatprep.subr.bf16.mxu0 %v680_v51  ;;  %745 = vmatprep.subr.bf16.mxu1 %v744_v52  ;;  %v570_v51 = vrot.slane %v565_v44, %v99_v19  ;;  %v587_v55 = vrot.slane %v582_v47, %v99_v19 }
  0xe1   :  { %683 = vmatpush1.bf16.msra.mxu0 %v682_v59  ;;  %747 = vmatpush1.bf16.msra.mxu1 %v746_v60  ;;  %v591_v59 = vrot.slane %v582_v47, %v103_v22 }
  0xe2   :  { %685 = vmatprep.subr.bf16.mxu0 %v684_v61  ;;  %749 = vmatprep.subr.bf16.mxu1 %v748_v62 }
  0xe5   :  { %687 = vmatpush1.bf16.msra.mxu0 %v686_v2  ;;  %751 = vmatpush1.bf16.msra.mxu1 %v750_v4 }
  0xe6   :  { %689 = vmatprep.subr.bf16.mxu0 %v688_v8  ;;  %753 = vmatprep.subr.bf16.mxu1 %v752_v12 }
  0xe9   :  { %691 = vmatpush1.bf16.msra.mxu0 %v690_v13  ;;  %755 = vmatpush1.bf16.msra.mxu1 %v754_v16 }
 0x17f   :  { %v187_v28 = vpop.f32.mrb[0].mxu0  ;;  %v258_v29 = vpop.f32.mrb[0].mxu1 }
 0x180   :  { %v188_v30 = vadd.f32 %v187_v28, %v100_v24  ;;  %v259_v31 = vadd.f32 %v258_v29, %v108_v25  ;;  %v189_v32 = vpop.f32.mrb[1].mxu0  ;;  %v260_v33 = vpop.f32.mrb[1].mxu1 }
 0x181   :  { %v190_v34 = vadd.f32 %v189_v32, %v104_v26  ;;  %v261_v35 = vadd.f32 %v260_v33, %v112_v27 }
 0x182   :  { %v263_v38 = vmax.f32 %v188_v30, 0.0  ;;  %v265_v39 = vmax.f32 %v259_v31, 0.0 }
 0x183   :  { %v264_v36 = vmax.f32 %v190_v34, 0.0  ;;  %v266_v37 = vmax.f32 %v261_v35, 0.0 }
 0x185   :  { %407 = vmatprep.mubr.f32.mxu0 %v264_v36  ;;  %556 = vmatprep.mubr.f32.mxu1 %v266_v37 }
 0x186   :  { %408 = vmatmul.mubr.f32.vlgmr.msra.gmra.mrb[2].mxu0 %v263_v38  ;;  %557 = vmatmul.mubr.f32.vlgmr.msra.gmra.mrb[2].mxu1 %v265_v39 }
 0x259   :  { %v409_v48 = vpop.f32.mrb[2].mxu0  ;;  %v558_v49 = vpop.f32.mrb[2].mxu1 }
 0x25a   :  { %v410_v50 = vadd.f32 %v409_v48, %v336_v42  ;;  %v559_v52 = vadd.f32 %v558_v49, %v485_v43  ;;  %v411_v53 = vpop.f32.mrb[3].mxu0  ;;  %v560_v54 = vpop.f32.mrb[3].mxu1 }
 0x25b   :  { %v412_v56 = vadd.f32 %v411_v53, %v340_v45  ;;  %v561_v58 = vadd.f32 %v560_v54, %v489_v46 }
 0x25c   :  { %v414_v60 = vmax.f32 %v410_v50, 0.0  ;;  %v563_v61 = vmax.f32 %v559_v52, 0.0 }
 0x25d   :  { %v415_v62 = vmax.f32 %v412_v56, 0.0  ;;  %v564_v63 = vmax.f32 %v561_v58, 0.0 }
 0x25e   :  { %v577_v0 = vmul.f32 %v570_v51, %v414_v60  ;;  %v594_v1 = vmul.f32 %v587_v55, %v563_v61 }
 0x25f   :  { %v578_v2 = vmul.f32 %v574_v57, %v415_v62  ;;  %v595_v3 = vmul.f32 %v591_v59, %v564_v63 }
 0x261   :  { %v596_v4 = vadd.f32 %v595_v3, %v594_v1  ;;  %v579_v5 = vadd.f32 %v578_v2, %v577_v0 }
 0x263   :  { %597 = vadd.xlane.f32.xlu1 %v596_v4  ;;  %580 = vadd.xlane.f32.xlu0 %v579_v5 }
 0x2f0   :  { %v598_v7 = vpop.xlane.xlu1 %597  ;;  %v581_v8 = vpop.xlane.xlu0 %580 }
 0x2f1   :  { %v600_v9 = vsel %vm599_vm2, %v581_v8, %v598_v7 }
 0x2f2   :  { %v608_v10 = vadd.f32 %v619_v6, %v600_v9 }
 0x2f4   :  { %610 = vst.msk [vmem:[%s986_s11] sm:$0xff] %vm609_vm3, %v608_v10 }
 0x2f5   :  { %615 = vsyncpa [#allocation3], 1 }
 0x2f6   :  { %616 = vsyncpa [#allocation5], 1 }

</bundles_post_ra>
